<compile_context>
chip_gen: v7x
topology: tpu7x:2x2x1
jax: 0.10.0
libtpu: 0.0.40
codegen_flags: <defaults>
</compile_context>

<pallas_src>
import functools

import jax
import jax.numpy as jnp
import numpy as np
from jax.experimental import pallas as pl
from jax.experimental.pallas import tpu as pltpu


def _char_rnn_kernel(pre0_ref, h0_ref, whh0_ref, bhh0_ref, wcat_ref, bcat_ref,
                     wd_ref, bd_ref, out_ref, hN_ref, htop_ref,
                     *, n_layers, seq_len):
    L, T = n_layers, seq_len
    B = h0_ref.shape[1]

    # Hidden state per layer, carried as values (vregs) across the unrolled
    # time loop -- the recurrence never touches HBM.
    h = [h0_ref[l] for l in range(L)]

    # Hoist all weight/bias loads out of the time loop.
    whh0 = whh0_ref[...]
    bhh0 = bhh0_ref[...]
    wcats = [wcat_ref[l] for l in range(L - 1)]
    bcats = [bcat_ref[l] for l in range(L - 1)]

    for t in range(T):
        # Layer 0: the input projection (x @ W_ih0 + b_ih0) was precomputed
        # (pre0); only h @ W_hh0 remains on the serial path.
        h[0] = jnp.tanh(
            pre0_ref[t]
            + jnp.dot(h[0], whh0, preferred_element_type=jnp.float32)
            + bhh0)
        x_in = h[0]

        # Layers 1..L-1: one fused matmul per layer:
        #   tanh([x, h_prev] @ [W_ih; W_hh] + (b_ih + b_hh))
        for l in range(1, L):
            cat = jnp.concatenate([x_in, h[l]], axis=-1)          # (B, 2H)
            h[l] = jnp.tanh(
                jnp.dot(cat, wcats[l - 1], preferred_element_type=jnp.float32)
                + bcats[l - 1])
            x_in = h[l]

        # Stash the top-layer hidden for the batched decode after the loop.
        htop_ref[pl.ds(t * B, B), :] = x_in

    # Decode off the serial path: one lane-dense (T*B, H) @ (H, Vpad) matmul.
    out_ref[...] = (jnp.dot(htop_ref[...], wd_ref[...],
                            preferred_element_type=jnp.float32)
                    + bd_ref[...])

    # Final hidden state of every layer (PyTorch convention).
    for l in range(L):
        hN_ref[l] = h[l]


def char_rnn_forward(tokens, params, hidden=None):
    """tokens: (B, T) int32.  Returns (output (B, T, V), hidden (L, B, H))."""
    emb = params["embedding"]          # (V, H)
    wih = params["wih"]                # (L, H, H)  pre-transposed: x @ wih[l]
    whh = params["whh"]                # (L, H, H)  pre-transposed: h @ whh[l]
    bih = params["bih"]                # (L, 1, H)
    bhh = params["bhh"]                # (L, 1, H)
    wd = params["wd"]                  # (H, V)     pre-transposed: h @ wd
    bd = params["bd"]                  # (1, V)

    B, T = tokens.shape
    V, H = emb.shape
    L = wih.shape[0]
    Vp = ((V + 127) // 128) * 128      # lane-dense padded vocab width

    if hidden is None:
        hidden = jnp.zeros((L, B, H), jnp.float32)

    # Embedding gather directly into time-major layout (transpose fused into gather).
    x_tm = jnp.take(emb, tokens.T, axis=0)                          # (T, B, H)

    # Hoist the layer-0 input projection off the recurrence (batched over T*B).
    pre0 = jnp.tensordot(x_tm, wih[0], axes=([2], [0])) + bih[0]    # (T, B, H)

    # Fuse ih/hh weights + biases for layers 1..L-1.
    if L > 1:
        wcat = jnp.concatenate([wih[1:], whh[1:]], axis=1)          # (L-1, 2H, H)
        bcat = bih[1:] + bhh[1:]                                    # (L-1, 1, H)
    else:  # dummy (never read in-kernel when L == 1)
        wcat = jnp.zeros((1, 2 * H, H), jnp.float32)
        bcat = jnp.zeros((1, 1, H), jnp.float32)

    # Zero-pad the decode weights to a lane-dense width (unmasked stores).
    wd_p = jnp.zeros((H, Vp), jnp.float32).at[:, :V].set(wd)
    bd_p = jnp.zeros((1, Vp), jnp.float32).at[:, :V].set(bd)

    whh0 = whh[0]                                                   # (H, H)
    bhh0 = bhh[0]                                                   # (1, H)

    kernel = functools.partial(_char_rnn_kernel, n_layers=L, seq_len=T)

    out_flat, h_final = pl.pallas_call(
        kernel,
        out_shape=(
            jax.ShapeDtypeStruct((T * B, Vp), jnp.float32),
            jax.ShapeDtypeStruct((L, B, H), jnp.float32),
        ),
        grid_spec=pltpu.PrefetchScalarGridSpec(
            num_scalar_prefetch=0,
            grid=(1,),
            in_specs=[
                pl.BlockSpec((T, B, H), lambda i: (0, 0, 0)),       # pre0
                pl.BlockSpec((L, B, H), lambda i: (0, 0, 0)),       # h0
                pl.BlockSpec((H, H), lambda i: (0, 0)),             # W_hh layer 0
                pl.BlockSpec((1, H), lambda i: (0, 0)),             # b_hh layer 0
                pl.BlockSpec(wcat.shape, lambda i: (0, 0, 0)),      # fused W layers 1..L-1
                pl.BlockSpec(bcat.shape, lambda i: (0, 0, 0)),      # fused b layers 1..L-1
                pl.BlockSpec((H, Vp), lambda i: (0, 0)),            # W_dec (padded)
                pl.BlockSpec((1, Vp), lambda i: (0, 0)),            # b_dec (padded)
            ],
            out_specs=[
                pl.BlockSpec((T * B, Vp), lambda i: (0, 0)),        # logits (flat, padded)
                pl.BlockSpec((L, B, H), lambda i: (0, 0, 0)),       # final hidden
            ],
            scratch_shapes=[pltpu.VMEM((T * B, H), jnp.float32)],   # top-layer hiddens
        ),
        compiler_params=pltpu.CompilerParams(
            dimension_semantics=("arbitrary",),
        ),
    )(pre0, hidden, whh0, bhh0, wcat, bcat, wd_p, bd_p)

    # (T*B, Vp) -> (B, T, V) batch-first, unpadded.
    output = out_flat.reshape(T, B, Vp).transpose(1, 0, 2)[:, :, :V]
    return output, h_final


def _reference_forward(tokens, params, hidden=None):
    """Pure-JAX reference for correctness checking."""
    emb, wih, whh = params["embedding"], params["wih"], params["whh"]
    bih, bhh, wd, bd = params["bih"], params["bhh"], params["wd"], params["bd"]
    B, T = tokens.shape
    L, _, H = wih.shape
    if hidden is None:
        hidden = jnp.zeros((L, B, H), jnp.float32)
    x = jnp.take(emb, tokens, axis=0)            # (B, T, H)
    h = hidden
    outs = []
    for t in range(T):
        inp = x[:, t, :]
        new_h = []
        for l in range(L):
            hl = jnp.tanh(inp @ wih[l] + bih[l] + h[l] @ whh[l] + bhh[l])
            new_h.append(hl)
            inp = hl
        h = jnp.stack(new_h, axis=0)
        outs.append(inp @ wd + bd)
    out = jnp.stack(outs, axis=1)                # (B, T, V)
    return out, h


def init_params(key, input_size=62, hidden_size=32, n_layers=3):
    V, H, L = input_size, hidden_size, n_layers
    ks = jax.random.split(key, 8)
    scale = 1.0 / np.sqrt(H)
    return {
        "embedding": jax.random.normal(ks[0], (V, H), jnp.float32),
        # stored pre-transposed so the kernel computes x @ W
        "wih": jax.random.uniform(ks[1], (L, H, H), jnp.float32, -scale, scale),
        "whh": jax.random.uniform(ks[2], (L, H, H), jnp.float32, -scale, scale),
        "bih": jax.random.uniform(ks[3], (L, 1, H), jnp.float32, -scale, scale),
        "bhh": jax.random.uniform(ks[4], (L, 1, H), jnp.float32, -scale, scale),
        "wd": jax.random.uniform(ks[5], (H, V), jnp.float32, -scale, scale),
        "bd": jax.random.uniform(ks[6], (1, V), jnp.float32, -scale, scale),
    }


if __name__ == "__main__":
    key = jax.random.PRNGKey(0)
    k_param, k_tok = jax.random.split(key)

    INPUT_SIZE = 62   # vocab / output size
    HIDDEN = 32
    N_LAYERS = 3
    B, T = 2, 8

    params = init_params(k_param, INPUT_SIZE, HIDDEN, N_LAYERS)
    tokens = jax.random.randint(k_tok, (B, T), 0, INPUT_SIZE, dtype=jnp.int32)

    out, hidden = char_rnn_forward(tokens, params)
    out, hidden = jax.block_until_ready((out, hidden))

    ref_out, ref_hidden = _reference_forward(tokens, params)
    np.testing.assert_allclose(np.asarray(out), np.asarray(ref_out),
                               rtol=1e-5, atol=1e-5)
    np.testing.assert_allclose(np.asarray(hidden), np.asarray(ref_hidden),
                               rtol=1e-5, atol=1e-5)

    assert out.shape == (B, T, INPUT_SIZE)
    assert hidden.shape == (N_LAYERS, B, HIDDEN)
    print("KERNEL_OK")
</pallas_src>

<mosaic_0001>
module attributes {stable_mosaic.version = 11 : i64} {
  func.func @_char_rnn_kernel(%arg0: i32, %arg1: memref<8x2x32xf32, #tpu.memory_space<vmem>>, %arg2: memref<3x2x32xf32, #tpu.memory_space<vmem>>, %arg3: memref<32x32xf32, #tpu.memory_space<vmem>>, %arg4: memref<1x32xf32, #tpu.memory_space<vmem>>, %arg5: memref<2x64x32xf32, #tpu.memory_space<vmem>>, %arg6: memref<2x1x32xf32, #tpu.memory_space<vmem>>, %arg7: memref<32x128xf32, #tpu.memory_space<vmem>>, %arg8: memref<1x128xf32, #tpu.memory_space<vmem>>, %arg9: memref<16x128xf32, #tpu.memory_space<vmem>>, %arg10: memref<3x2x32xf32, #tpu.memory_space<vmem>>, %arg11: memref<16x32xf32, #tpu.memory_space<vmem>>) attributes {dimension_semantics = [#tpu.dimension_semantics<arbitrary>], iteration_bounds = array<i64: 1>, scalar_prefetch = 0 : i64, scratch_operands = 1 : i64, tpu.core_type = #tpu.core_type<tc>, window_params = [{pipeline_mode = #tpu.pipeline_mode<synchronous>, transform_indices = @transform_0, window_bounds = array<i64: 8, 2, 32>}, {pipeline_mode = #tpu.pipeline_mode<synchronous>, transform_indices = @transform_1, window_bounds = array<i64: 3, 2, 32>}, {pipeline_mode = #tpu.pipeline_mode<synchronous>, transform_indices = @transform_2, window_bounds = array<i64: 32, 32>}, {pipeline_mode = #tpu.pipeline_mode<synchronous>, transform_indices = @transform_3, window_bounds = array<i64: 1, 32>}, {pipeline_mode = #tpu.pipeline_mode<synchronous>, transform_indices = @transform_4, window_bounds = array<i64: 2, 64, 32>}, {pipeline_mode = #tpu.pipeline_mode<synchronous>, transform_indices = @transform_5, window_bounds = array<i64: 2, 1, 32>}, {pipeline_mode = #tpu.pipeline_mode<synchronous>, transform_indices = @transform_6, window_bounds = array<i64: 32, 128>}, {pipeline_mode = #tpu.pipeline_mode<synchronous>, transform_indices = @transform_7, window_bounds = array<i64: 1, 128>}, {pipeline_mode = #tpu.pipeline_mode<synchronous>, transform_indices = @transform_8, window_bounds = array<i64: 16, 128>}, {pipeline_mode = #tpu.pipeline_mode<synchronous>, transform_indices = @transform_9, window_bounds = array<i64: 3, 2, 32>}]} {
    %c0 = arith.constant 0 : index
    %c0_0 = arith.constant 0 : index
    %c0_1 = arith.constant 0 : index
    %0 = vector.load %arg2[%c0, %c0_0, %c0_1] : memref<3x2x32xf32, #tpu.memory_space<vmem>>, vector<1x2x32xf32>
    %1 = vector.shape_cast %0 : vector<1x2x32xf32> to vector<2x32xf32>
    %c1 = arith.constant 1 : index
    %c0_2 = arith.constant 0 : index
    %c0_3 = arith.constant 0 : index
    %2 = vector.load %arg2[%c1, %c0_2, %c0_3] : memref<3x2x32xf32, #tpu.memory_space<vmem>>, vector<1x2x32xf32>
    %3 = vector.shape_cast %2 : vector<1x2x32xf32> to vector<2x32xf32>
    %c2 = arith.constant 2 : index
    %c0_4 = arith.constant 0 : index
    %c0_5 = arith.constant 0 : index
    %4 = vector.load %arg2[%c2, %c0_4, %c0_5] : memref<3x2x32xf32, #tpu.memory_space<vmem>>, vector<1x2x32xf32>
    %5 = vector.shape_cast %4 : vector<1x2x32xf32> to vector<2x32xf32>
    %c0_6 = arith.constant 0 : index
    %c0_7 = arith.constant 0 : index
    %6 = vector.load %arg3[%c0_6, %c0_7] : memref<32x32xf32, #tpu.memory_space<vmem>>, vector<32x32xf32>
    %c0_8 = arith.constant 0 : index
    %c0_9 = arith.constant 0 : index
    %7 = vector.load %arg4[%c0_8, %c0_9] : memref<1x32xf32, #tpu.memory_space<vmem>>, vector<1x32xf32>
    %c0_10 = arith.constant 0 : index
    %c0_11 = arith.constant 0 : index
    %c0_12 = arith.constant 0 : index
    %8 = vector.load %arg5[%c0_10, %c0_11, %c0_12] : memref<2x64x32xf32, #tpu.memory_space<vmem>>, vector<1x64x32xf32>
    %9 = vector.shape_cast %8 : vector<1x64x32xf32> to vector<64x32xf32>
    %c1_13 = arith.constant 1 : index
    %c0_14 = arith.constant 0 : index
    %c0_15 = arith.constant 0 : index
    %10 = vector.load %arg5[%c1_13, %c0_14, %c0_15] : memref<2x64x32xf32, #tpu.memory_space<vmem>>, vector<1x64x32xf32>
    %11 = vector.shape_cast %10 : vector<1x64x32xf32> to vector<64x32xf32>
    %c0_16 = arith.constant 0 : index
    %c0_17 = arith.constant 0 : index
    %c0_18 = arith.constant 0 : index
    %12 = vector.load %arg6[%c0_16, %c0_17, %c0_18] : memref<2x1x32xf32, #tpu.memory_space<vmem>>, vector<1x1x32xf32>
    %13 = vector.shape_cast %12 : vector<1x1x32xf32> to vector<1x32xf32>
    %c1_19 = arith.constant 1 : index
    %c0_20 = arith.constant 0 : index
    %c0_21 = arith.constant 0 : index
    %14 = vector.load %arg6[%c1_19, %c0_20, %c0_21] : memref<2x1x32xf32, #tpu.memory_space<vmem>>, vector<1x1x32xf32>
    %15 = vector.shape_cast %14 : vector<1x1x32xf32> to vector<1x32xf32>
    %c0_22 = arith.constant 0 : index
    %c0_23 = arith.constant 0 : index
    %c0_24 = arith.constant 0 : index
    %16 = vector.load %arg1[%c0_22, %c0_23, %c0_24] : memref<8x2x32xf32, #tpu.memory_space<vmem>>, vector<1x2x32xf32>
    %17 = vector.shape_cast %16 : vector<1x2x32xf32> to vector<2x32xf32>
    %cst = arith.constant dense<0.000000e+00> : vector<2x32xf32>
    %18 = tpu.matmul %1, %6, %cst {dimension_numbers = #tpu.dot_dimension_numbers<[1], [0], [0], [1], [0, 0, 1, 1], [], []>} : vector<2x32xf32>, vector<32x32xf32>, vector<2x32xf32> -> vector<2x32xf32>
    %19 = arith.addf %17, %18 : vector<2x32xf32>
    %20 = vector.broadcast %7 : vector<1x32xf32> to vector<2x32xf32>
    %21 = arith.addf %19, %20 : vector<2x32xf32>
    %22 = math.tanh %21 : vector<2x32xf32>
    %23 = tpu.concatenate %22, %3 in 1 : vector<2x32xf32>, vector<2x32xf32> -> vector<2x64xf32>
    %cst_25 = arith.constant dense<0.000000e+00> : vector<2x32xf32>
    %24 = tpu.matmul %23, %9, %cst_25 {dimension_numbers = #tpu.dot_dimension_numbers<[1], [0], [0], [1], [0, 0, 1, 1], [], []>} : vector<2x64xf32>, vector<64x32xf32>, vector<2x32xf32> -> vector<2x32xf32>
    %25 = vector.broadcast %13 : vector<1x32xf32> to vector<2x32xf32>
    %26 = arith.addf %24, %25 : vector<2x32xf32>
    %27 = math.tanh %26 : vector<2x32xf32>
    %28 = tpu.concatenate %27, %5 in 1 : vector<2x32xf32>, vector<2x32xf32> -> vector<2x64xf32>
    %cst_26 = arith.constant dense<0.000000e+00> : vector<2x32xf32>
    %29 = tpu.matmul %28, %11, %cst_26 {dimension_numbers = #tpu.dot_dimension_numbers<[1], [0], [0], [1], [0, 0, 1, 1], [], []>} : vector<2x64xf32>, vector<64x32xf32>, vector<2x32xf32> -> vector<2x32xf32>
    %30 = vector.broadcast %15 : vector<1x32xf32> to vector<2x32xf32>
    %31 = arith.addf %29, %30 : vector<2x32xf32>
    %32 = math.tanh %31 : vector<2x32xf32>
    %c0_27 = arith.constant 0 : index
    %c0_28 = arith.constant 0 : index
    %33 = vector.load %arg11[%c0_27, %c0_28] : memref<16x32xf32, #tpu.memory_space<vmem>>, vector<2x32xf32>
    tpu.vector_store %arg11[%c0_27, %c0_28], %32 {strides = array<i32>} : memref<16x32xf32, #tpu.memory_space<vmem>>, vector<2x32xf32>,
    %c1_29 = arith.constant 1 : index
    %c0_30 = arith.constant 0 : index
    %c0_31 = arith.constant 0 : index
    %34 = vector.load %arg1[%c1_29, %c0_30, %c0_31] : memref<8x2x32xf32, #tpu.memory_space<vmem>>, vector<1x2x32xf32>
    %35 = vector.shape_cast %34 : vector<1x2x32xf32> to vector<2x32xf32>
    %cst_32 = arith.constant dense<0.000000e+00> : vector<2x32xf32>
    %36 = tpu.matmul %22, %6, %cst_32 {dimension_numbers = #tpu.dot_dimension_numbers<[1], [0], [0], [1], [0, 0, 1, 1], [], []>} : vector<2x32xf32>, vector<32x32xf32>, vector<2x32xf32> -> vector<2x32xf32>
    %37 = arith.addf %35, %36 : vector<2x32xf32>
    %38 = vector.broadcast %7 : vector<1x32xf32> to vector<2x32xf32>
    %39 = arith.addf %37, %38 : vector<2x32xf32>
    %40 = math.tanh %39 : vector<2x32xf32>
    %41 = tpu.concatenate %40, %27 in 1 : vector<2x32xf32>, vector<2x32xf32> -> vector<2x64xf32>
    %cst_33 = arith.constant dense<0.000000e+00> : vector<2x32xf32>
    %42 = tpu.matmul %41, %9, %cst_33 {dimension_numbers = #tpu.dot_dimension_numbers<[1], [0], [0], [1], [0, 0, 1, 1], [], []>} : vector<2x64xf32>, vector<64x32xf32>, vector<2x32xf32> -> vector<2x32xf32>
    %43 = vector.broadcast %13 : vector<1x32xf32> to vector<2x32xf32>
    %44 = arith.addf %42, %43 : vector<2x32xf32>
    %45 = math.tanh %44 : vector<2x32xf32>
    %46 = tpu.concatenate %45, %32 in 1 : vector<2x32xf32>, vector<2x32xf32> -> vector<2x64xf32>
    %cst_34 = arith.constant dense<0.000000e+00> : vector<2x32xf32>
    %47 = tpu.matmul %46, %11, %cst_34 {dimension_numbers = #tpu.dot_dimension_numbers<[1], [0], [0], [1], [0, 0, 1, 1], [], []>} : vector<2x64xf32>, vector<64x32xf32>, vector<2x32xf32> -> vector<2x32xf32>
    %48 = vector.broadcast %15 : vector<1x32xf32> to vector<2x32xf32>
    %49 = arith.addf %47, %48 : vector<2x32xf32>
    %50 = math.tanh %49 : vector<2x32xf32>
    %c2_35 = arith.constant 2 : index
    %c0_36 = arith.constant 0 : index
    %51 = vector.load %arg11[%c2_35, %c0_36] : memref<16x32xf32, #tpu.memory_space<vmem>>, vector<2x32xf32>
    tpu.vector_store %arg11[%c2_35, %c0_36], %50 {strides = array<i32>} : memref<16x32xf32, #tpu.memory_space<vmem>>, vector<2x32xf32>,
    %c2_37 = arith.constant 2 : index
    %c0_38 = arith.constant 0 : index
    %c0_39 = arith.constant 0 : index
    %52 = vector.load %arg1[%c2_37, %c0_38, %c0_39] : memref<8x2x32xf32, #tpu.memory_space<vmem>>, vector<1x2x32xf32>
    %53 = vector.shape_cast %52 : vector<1x2x32xf32> to vector<2x32xf32>
    %cst_40 = arith.constant dense<0.000000e+00> : vector<2x32xf32>
    %54 = tpu.matmul %40, %6, %cst_40 {dimension_numbers = #tpu.dot_dimension_numbers<[1], [0], [0], [1], [0, 0, 1, 1], [], []>} : vector<2x32xf32>, vector<32x32xf32>, vector<2x32xf32> -> vector<2x32xf32>
    %55 = arith.addf %53, %54 : vector<2x32xf32>
    %56 = vector.broadcast %7 : vector<1x32xf32> to vector<2x32xf32>
    %57 = arith.addf %55, %56 : vector<2x32xf32>
    %58 = math.tanh %57 : vector<2x32xf32>
    %59 = tpu.concatenate %58, %45 in 1 : vector<2x32xf32>, vector<2x32xf32> -> vector<2x64xf32>
    %cst_41 = arith.constant dense<0.000000e+00> : vector<2x32xf32>
    %60 = tpu.matmul %59, %9, %cst_41 {dimension_numbers = #tpu.dot_dimension_numbers<[1], [0], [0], [1], [0, 0, 1, 1], [], []>} : vector<2x64xf32>, vector<64x32xf32>, vector<2x32xf32> -> vector<2x32xf32>
    %61 = vector.broadcast %13 : vector<1x32xf32> to vector<2x32xf32>
    %62 = arith.addf %60, %61 : vector<2x32xf32>
    %63 = math.tanh %62 : vector<2x32xf32>
    %64 = tpu.concatenate %63, %50 in 1 : vector<2x32xf32>, vector<2x32xf32> -> vector<2x64xf32>
    %cst_42 = arith.constant dense<0.000000e+00> : vector<2x32xf32>
    %65 = tpu.matmul %64, %11, %cst_42 {dimension_numbers = #tpu.dot_dimension_numbers<[1], [0], [0], [1], [0, 0, 1, 1], [], []>} : vector<2x64xf32>, vector<64x32xf32>, vector<2x32xf32> -> vector<2x32xf32>
    %66 = vector.broadcast %15 : vector<1x32xf32> to vector<2x32xf32>
    %67 = arith.addf %65, %66 : vector<2x32xf32>
    %68 = math.tanh %67 : vector<2x32xf32>
    %c4 = arith.constant 4 : index
    %c0_43 = arith.constant 0 : index
    %69 = vector.load %arg11[%c4, %c0_43] : memref<16x32xf32, #tpu.memory_space<vmem>>, vector<2x32xf32>
    tpu.vector_store %arg11[%c4, %c0_43], %68 {strides = array<i32>} : memref<16x32xf32, #tpu.memory_space<vmem>>, vector<2x32xf32>,
    %c3 = arith.constant 3 : index
    %c0_44 = arith.constant 0 : index
    %c0_45 = arith.constant 0 : index
    %70 = vector.load %arg1[%c3, %c0_44, %c0_45] : memref<8x2x32xf32, #tpu.memory_space<vmem>>, vector<1x2x32xf32>
    %71 = vector.shape_cast %70 : vector<1x2x32xf32> to vector<2x32xf32>
    %cst_46 = arith.constant dense<0.000000e+00> : vector<2x32xf32>
    %72 = tpu.matmul %58, %6, %cst_46 {dimension_numbers = #tpu.dot_dimension_numbers<[1], [0], [0], [1], [0, 0, 1, 1], [], []>} : vector<2x32xf32>, vector<32x32xf32>, vector<2x32xf32> -> vector<2x32xf32>
    %73 = arith.addf %71, %72 : vector<2x32xf32>
    %74 = vector.broadcast %7 : vector<1x32xf32> to vector<2x32xf32>
    %75 = arith.addf %73, %74 : vector<2x32xf32>
    %76 = math.tanh %75 : vector<2x32xf32>
    %77 = tpu.concatenate %76, %63 in 1 : vector<2x32xf32>, vector<2x32xf32> -> vector<2x64xf32>
    %cst_47 = arith.constant dense<0.000000e+00> : vector<2x32xf32>
    %78 = tpu.matmul %77, %9, %cst_47 {dimension_numbers = #tpu.dot_dimension_numbers<[1], [0], [0], [1], [0, 0, 1, 1], [], []>} : vector<2x64xf32>, vector<64x32xf32>, vector<2x32xf32> -> vector<2x32xf32>
    %79 = vector.broadcast %13 : vector<1x32xf32> to vector<2x32xf32>
    %80 = arith.addf %78, %79 : vector<2x32xf32>
    %81 = math.tanh %80 : vector<2x32xf32>
    %82 = tpu.concatenate %81, %68 in 1 : vector<2x32xf32>, vector<2x32xf32> -> vector<2x64xf32>
    %cst_48 = arith.constant dense<0.000000e+00> : vector<2x32xf32>
    %83 = tpu.matmul %82, %11, %cst_48 {dimension_numbers = #tpu.dot_dimension_numbers<[1], [0], [0], [1], [0, 0, 1, 1], [], []>} : vector<2x64xf32>, vector<64x32xf32>, vector<2x32xf32> -> vector<2x32xf32>
    %84 = vector.broadcast %15 : vector<1x32xf32> to vector<2x32xf32>
    %85 = arith.addf %83, %84 : vector<2x32xf32>
    %86 = math.tanh %85 : vector<2x32xf32>
    %c6 = arith.constant 6 : index
    %c0_49 = arith.constant 0 : index
    %87 = vector.load %arg11[%c6, %c0_49] : memref<16x32xf32, #tpu.memory_space<vmem>>, vector<2x32xf32>
    tpu.vector_store %arg11[%c6, %c0_49], %86 {strides = array<i32>} : memref<16x32xf32, #tpu.memory_space<vmem>>, vector<2x32xf32>,
    %c4_50 = arith.constant 4 : index
    %c0_51 = arith.constant 0 : index
    %c0_52 = arith.constant 0 : index
    %88 = vector.load %arg1[%c4_50, %c0_51, %c0_52] : memref<8x2x32xf32, #tpu.memory_space<vmem>>, vector<1x2x32xf32>
    %89 = vector.shape_cast %88 : vector<1x2x32xf32> to vector<2x32xf32>
    %cst_53 = arith.constant dense<0.000000e+00> : vector<2x32xf32>
    %90 = tpu.matmul %76, %6, %cst_53 {dimension_numbers = #tpu.dot_dimension_numbers<[1], [0], [0], [1], [0, 0, 1, 1], [], []>} : vector<2x32xf32>, vector<32x32xf32>, vector<2x32xf32> -> vector<2x32xf32>
    %91 = arith.addf %89, %90 : vector<2x32xf32>
    %92 = vector.broadcast %7 : vector<1x32xf32> to vector<2x32xf32>
    %93 = arith.addf %91, %92 : vector<2x32xf32>
    %94 = math.tanh %93 : vector<2x32xf32>
    %95 = tpu.concatenate %94, %81 in 1 : vector<2x32xf32>, vector<2x32xf32> -> vector<2x64xf32>
    %cst_54 = arith.constant dense<0.000000e+00> : vector<2x32xf32>
    %96 = tpu.matmul %95, %9, %cst_54 {dimension_numbers = #tpu.dot_dimension_numbers<[1], [0], [0], [1], [0, 0, 1, 1], [], []>} : vector<2x64xf32>, vector<64x32xf32>, vector<2x32xf32> -> vector<2x32xf32>
    %97 = vector.broadcast %13 : vector<1x32xf32> to vector<2x32xf32>
    %98 = arith.addf %96, %97 : vector<2x32xf32>
    %99 = math.tanh %98 : vector<2x32xf32>
    %100 = tpu.concatenate %99, %86 in 1 : vector<2x32xf32>, vector<2x32xf32> -> vector<2x64xf32>
    %cst_55 = arith.constant dense<0.000000e+00> : vector<2x32xf32>
    %101 = tpu.matmul %100, %11, %cst_55 {dimension_numbers = #tpu.dot_dimension_numbers<[1], [0], [0], [1], [0, 0, 1, 1], [], []>} : vector<2x64xf32>, vector<64x32xf32>, vector<2x32xf32> -> vector<2x32xf32>
    %102 = vector.broadcast %15 : vector<1x32xf32> to vector<2x32xf32>
    %103 = arith.addf %101, %102 : vector<2x32xf32>
    %104 = math.tanh %103 : vector<2x32xf32>
    %c8 = arith.constant 8 : index
    %c0_56 = arith.constant 0 : index
    %105 = vector.load %arg11[%c8, %c0_56] : memref<16x32xf32, #tpu.memory_space<vmem>>, vector<2x32xf32>
    tpu.vector_store %arg11[%c8, %c0_56], %104 {strides = array<i32>} : memref<16x32xf32, #tpu.memory_space<vmem>>, vector<2x32xf32>,
    %c5 = arith.constant 5 : index
    %c0_57 = arith.constant 0 : index
    %c0_58 = arith.constant 0 : index
    %106 = vector.load %arg1[%c5, %c0_57, %c0_58] : memref<8x2x32xf32, #tpu.memory_space<vmem>>, vector<1x2x32xf32>
    %107 = vector.shape_cast %106 : vector<1x2x32xf32> to vector<2x32xf32>
    %cst_59 = arith.constant dense<0.000000e+00> : vector<2x32xf32>
    %108 = tpu.matmul %94, %6, %cst_59 {dimension_numbers = #tpu.dot_dimension_numbers<[1], [0], [0], [1], [0, 0, 1, 1], [], []>} : vector<2x32xf32>, vector<32x32xf32>, vector<2x32xf32> -> vector<2x32xf32>
    %109 = arith.addf %107, %108 : vector<2x32xf32>
    %110 = vector.broadcast %7 : vector<1x32xf32> to vector<2x32xf32>
    %111 = arith.addf %109, %110 : vector<2x32xf32>
    %112 = math.tanh %111 : vector<2x32xf32>
    %113 = tpu.concatenate %112, %99 in 1 : vector<2x32xf32>, vector<2x32xf32> -> vector<2x64xf32>
    %cst_60 = arith.constant dense<0.000000e+00> : vector<2x32xf32>
    %114 = tpu.matmul %113, %9, %cst_60 {dimension_numbers = #tpu.dot_dimension_numbers<[1], [0], [0], [1], [0, 0, 1, 1], [], []>} : vector<2x64xf32>, vector<64x32xf32>, vector<2x32xf32> -> vector<2x32xf32>
    %115 = vector.broadcast %13 : vector<1x32xf32> to vector<2x32xf32>
    %116 = arith.addf %114, %115 : vector<2x32xf32>
    %117 = math.tanh %116 : vector<2x32xf32>
    %118 = tpu.concatenate %117, %104 in 1 : vector<2x32xf32>, vector<2x32xf32> -> vector<2x64xf32>
    %cst_61 = arith.constant dense<0.000000e+00> : vector<2x32xf32>
    %119 = tpu.matmul %118, %11, %cst_61 {dimension_numbers = #tpu.dot_dimension_numbers<[1], [0], [0], [1], [0, 0, 1, 1], [], []>} : vector<2x64xf32>, vector<64x32xf32>, vector<2x32xf32> -> vector<2x32xf32>
    %120 = vector.broadcast %15 : vector<1x32xf32> to vector<2x32xf32>
    %121 = arith.addf %119, %120 : vector<2x32xf32>
    %122 = math.tanh %121 : vector<2x32xf32>
    %c10 = arith.constant 10 : index
    %c0_62 = arith.constant 0 : index
    %123 = vector.load %arg11[%c10, %c0_62] : memref<16x32xf32, #tpu.memory_space<vmem>>, vector<2x32xf32>
    tpu.vector_store %arg11[%c10, %c0_62], %122 {strides = array<i32>} : memref<16x32xf32, #tpu.memory_space<vmem>>, vector<2x32xf32>,
    %c6_63 = arith.constant 6 : index
    %c0_64 = arith.constant 0 : index
    %c0_65 = arith.constant 0 : index
    %124 = vector.load %arg1[%c6_63, %c0_64, %c0_65] : memref<8x2x32xf32, #tpu.memory_space<vmem>>, vector<1x2x32xf32>
    %125 = vector.shape_cast %124 : vector<1x2x32xf32> to vector<2x32xf32>
    %cst_66 = arith.constant dense<0.000000e+00> : vector<2x32xf32>
    %126 = tpu.matmul %112, %6, %cst_66 {dimension_numbers = #tpu.dot_dimension_numbers<[1], [0], [0], [1], [0, 0, 1, 1], [], []>} : vector<2x32xf32>, vector<32x32xf32>, vector<2x32xf32> -> vector<2x32xf32>
    %127 = arith.addf %125, %126 : vector<2x32xf32>
    %128 = vector.broadcast %7 : vector<1x32xf32> to vector<2x32xf32>
    %129 = arith.addf %127, %128 : vector<2x32xf32>
    %130 = math.tanh %129 : vector<2x32xf32>
    %131 = tpu.concatenate %130, %117 in 1 : vector<2x32xf32>, vector<2x32xf32> -> vector<2x64xf32>
    %cst_67 = arith.constant dense<0.000000e+00> : vector<2x32xf32>
    %132 = tpu.matmul %131, %9, %cst_67 {dimension_numbers = #tpu.dot_dimension_numbers<[1], [0], [0], [1], [0, 0, 1, 1], [], []>} : vector<2x64xf32>, vector<64x32xf32>, vector<2x32xf32> -> vector<2x32xf32>
    %133 = vector.broadcast %13 : vector<1x32xf32> to vector<2x32xf32>
    %134 = arith.addf %132, %133 : vector<2x32xf32>
    %135 = math.tanh %134 : vector<2x32xf32>
    %136 = tpu.concatenate %135, %122 in 1 : vector<2x32xf32>, vector<2x32xf32> -> vector<2x64xf32>
    %cst_68 = arith.constant dense<0.000000e+00> : vector<2x32xf32>
    %137 = tpu.matmul %136, %11, %cst_68 {dimension_numbers = #tpu.dot_dimension_numbers<[1], [0], [0], [1], [0, 0, 1, 1], [], []>} : vector<2x64xf32>, vector<64x32xf32>, vector<2x32xf32> -> vector<2x32xf32>
    %138 = vector.broadcast %15 : vector<1x32xf32> to vector<2x32xf32>
    %139 = arith.addf %137, %138 : vector<2x32xf32>
    %140 = math.tanh %139 : vector<2x32xf32>
    %c12 = arith.constant 12 : index
    %c0_69 = arith.constant 0 : index
    %141 = vector.load %arg11[%c12, %c0_69] : memref<16x32xf32, #tpu.memory_space<vmem>>, vector<2x32xf32>
    tpu.vector_store %arg11[%c12, %c0_69], %140 {strides = array<i32>} : memref<16x32xf32, #tpu.memory_space<vmem>>, vector<2x32xf32>,
    %c7 = arith.constant 7 : index
    %c0_70 = arith.constant 0 : index
    %c0_71 = arith.constant 0 : index
    %142 = vector.load %arg1[%c7, %c0_70, %c0_71] : memref<8x2x32xf32, #tpu.memory_space<vmem>>, vector<1x2x32xf32>
    %143 = vector.shape_cast %142 : vector<1x2x32xf32> to vector<2x32xf32>
    %cst_72 = arith.constant dense<0.000000e+00> : vector<2x32xf32>
    %144 = tpu.matmul %130, %6, %cst_72 {dimension_numbers = #tpu.dot_dimension_numbers<[1], [0], [0], [1], [0, 0, 1, 1], [], []>} : vector<2x32xf32>, vector<32x32xf32>, vector<2x32xf32> -> vector<2x32xf32>
    %145 = arith.addf %143, %144 : vector<2x32xf32>
    %146 = vector.broadcast %7 : vector<1x32xf32> to vector<2x32xf32>
    %147 = arith.addf %145, %146 : vector<2x32xf32>
    %148 = math.tanh %147 : vector<2x32xf32>
    %149 = tpu.concatenate %148, %135 in 1 : vector<2x32xf32>, vector<2x32xf32> -> vector<2x64xf32>
    %cst_73 = arith.constant dense<0.000000e+00> : vector<2x32xf32>
    %150 = tpu.matmul %149, %9, %cst_73 {dimension_numbers = #tpu.dot_dimension_numbers<[1], [0], [0], [1], [0, 0, 1, 1], [], []>} : vector<2x64xf32>, vector<64x32xf32>, vector<2x32xf32> -> vector<2x32xf32>
    %151 = vector.broadcast %13 : vector<1x32xf32> to vector<2x32xf32>
    %152 = arith.addf %150, %151 : vector<2x32xf32>
    %153 = math.tanh %152 : vector<2x32xf32>
    %154 = tpu.concatenate %153, %140 in 1 : vector<2x32xf32>, vector<2x32xf32> -> vector<2x64xf32>
    %cst_74 = arith.constant dense<0.000000e+00> : vector<2x32xf32>
    %155 = tpu.matmul %154, %11, %cst_74 {dimension_numbers = #tpu.dot_dimension_numbers<[1], [0], [0], [1], [0, 0, 1, 1], [], []>} : vector<2x64xf32>, vector<64x32xf32>, vector<2x32xf32> -> vector<2x32xf32>
    %156 = vector.broadcast %15 : vector<1x32xf32> to vector<2x32xf32>
    %157 = arith.addf %155, %156 : vector<2x32xf32>
    %158 = math.tanh %157 : vector<2x32xf32>
    %c14 = arith.constant 14 : index
    %c0_75 = arith.constant 0 : index
    %159 = vector.load %arg11[%c14, %c0_75] : memref<16x32xf32, #tpu.memory_space<vmem>>, vector<2x32xf32>
    tpu.vector_store %arg11[%c14, %c0_75], %158 {strides = array<i32>} : memref<16x32xf32, #tpu.memory_space<vmem>>, vector<2x32xf32>,
    %c0_76 = arith.constant 0 : index
    %c0_77 = arith.constant 0 : index
    %160 = vector.load %arg11[%c0_76, %c0_77] : memref<16x32xf32, #tpu.memory_space<vmem>>, vector<16x32xf32>
    %c0_78 = arith.constant 0 : index
    %c0_79 = arith.constant 0 : index
    %161 = vector.load %arg7[%c0_78, %c0_79] : memref<32x128xf32, #tpu.memory_space<vmem>>, vector<32x128xf32>
    %cst_80 = arith.constant dense<0.000000e+00> : vector<16x128xf32>
    %162 = tpu.matmul %160, %161, %cst_80 {dimension_numbers = #tpu.dot_dimension_numbers<[1], [0], [0], [1], [0, 0, 1, 1], [], []>} : vector<16x32xf32>, vector<32x128xf32>, vector<16x128xf32> -> vector<16x128xf32>
    %c0_81 = arith.constant 0 : index
    %c0_82 = arith.constant 0 : index
    %163 = vector.load %arg8[%c0_81, %c0_82] : memref<1x128xf32, #tpu.memory_space<vmem>>, vector<1x128xf32>
    %164 = vector.broadcast %163 : vector<1x128xf32> to vector<16x128xf32>
    %165 = arith.addf %162, %164 : vector<16x128xf32>
    %c0_83 = arith.constant 0 : index
    %c0_84 = arith.constant 0 : index
    %166 = vector.load %arg9[%c0_83, %c0_84] : memref<16x128xf32, #tpu.memory_space<vmem>>, vector<16x128xf32>
    tpu.vector_store %arg9[%c0_83, %c0_84], %165 {strides = array<i32>} : memref<16x128xf32, #tpu.memory_space<vmem>>, vector<16x128xf32>,
    %c0_85 = arith.constant 0 : index
    %c0_86 = arith.constant 0 : index
    %c0_87 = arith.constant 0 : index
    %167 = vector.load %arg10[%c0_85, %c0_86, %c0_87] : memref<3x2x32xf32, #tpu.memory_space<vmem>>, vector<1x2x32xf32>
    %168 = vector.shape_cast %167 : vector<1x2x32xf32> to vector<2x32xf32>
    %169 = vector.shape_cast %148 : vector<2x32xf32> to vector<1x2x32xf32>
    tpu.vector_store %arg10[%c0_85, %c0_86, %c0_87], %169 {strides = array<i32>} : memref<3x2x32xf32, #tpu.memory_space<vmem>>, vector<1x2x32xf32>,
    %c1_88 = arith.constant 1 : index
    %c0_89 = arith.constant 0 : index
    %c0_90 = arith.constant 0 : index
    %170 = vector.load %arg10[%c1_88, %c0_89, %c0_90] : memref<3x2x32xf32, #tpu.memory_space<vmem>>, vector<1x2x32xf32>
    %171 = vector.shape_cast %170 : vector<1x2x32xf32> to vector<2x32xf32>
    %172 = vector.shape_cast %153 : vector<2x32xf32> to vector<1x2x32xf32>
    tpu.vector_store %arg10[%c1_88, %c0_89, %c0_90], %172 {strides = array<i32>} : memref<3x2x32xf32, #tpu.memory_space<vmem>>, vector<1x2x32xf32>,
    %c2_91 = arith.constant 2 : index
    %c0_92 = arith.constant 0 : index
    %c0_93 = arith.constant 0 : index
    %173 = vector.load %arg10[%c2_91, %c0_92, %c0_93] : memref<3x2x32xf32, #tpu.memory_space<vmem>>, vector<1x2x32xf32>
    %174 = vector.shape_cast %173 : vector<1x2x32xf32> to vector<2x32xf32>
    %175 = vector.shape_cast %158 : vector<2x32xf32> to vector<1x2x32xf32>
    tpu.vector_store %arg10[%c2_91, %c0_92, %c0_93], %175 {strides = array<i32>} : memref<3x2x32xf32, #tpu.memory_space<vmem>>, vector<1x2x32xf32>,
    return
  }
  func.func @transform_0(%arg0: i32) -> (i32, i32, i32) {
    %c0_i32 = arith.constant 0 : i32
    %c0_i32_0 = arith.constant 0 : i32
    %c0_i32_1 = arith.constant 0 : i32
    %c0_i32_2 = arith.constant 0 : i32
    return %c0_i32, %c0_i32_0, %c0_i32_1 : i32, i32, i32
  }
  func.func @transform_1(%arg0: i32) -> (i32, i32, i32) {
    %c0_i32 = arith.constant 0 : i32
    %c0_i32_0 = arith.constant 0 : i32
    %c0_i32_1 = arith.constant 0 : i32
    %c0_i32_2 = arith.constant 0 : i32
    return %c0_i32, %c0_i32_0, %c0_i32_1 : i32, i32, i32
  }
  func.func @transform_2(%arg0: i32) -> (i32, i32) {
    %c0_i32 = arith.constant 0 : i32
    %c0_i32_0 = arith.constant 0 : i32
    %c0_i32_1 = arith.constant 0 : i32
    return %c0_i32, %c0_i32_0 : i32, i32
  }
  func.func @transform_3(%arg0: i32) -> (i32, i32) {
    %c0_i32 = arith.constant 0 : i32
    %c0_i32_0 = arith.constant 0 : i32
    %c0_i32_1 = arith.constant 0 : i32
    return %c0_i32, %c0_i32_0 : i32, i32
  }
  func.func @transform_4(%arg0: i32) -> (i32, i32, i32) {
    %c0_i32 = arith.constant 0 : i32
    %c0_i32_0 = arith.constant 0 : i32
    %c0_i32_1 = arith.constant 0 : i32
    %c0_i32_2 = arith.constant 0 : i32
    return %c0_i32, %c0_i32_0, %c0_i32_1 : i32, i32, i32
  }
  func.func @transform_5(%arg0: i32) -> (i32, i32, i32) {
    %c0_i32 = arith.constant 0 : i32
    %c0_i32_0 = arith.constant 0 : i32
    %c0_i32_1 = arith.constant 0 : i32
    %c0_i32_2 = arith.constant 0 : i32
    return %c0_i32, %c0_i32_0, %c0_i32_1 : i32, i32, i32
  }
  func.func @transform_6(%arg0: i32) -> (i32, i32) {
    %c0_i32 = arith.constant 0 : i32
    %c0_i32_0 = arith.constant 0 : i32
    %c0_i32_1 = arith.constant 0 : i32
    return %c0_i32, %c0_i32_0 : i32, i32
  }
  func.func @transform_7(%arg0: i32) -> (i32, i32) {
    %c0_i32 = arith.constant 0 : i32
    %c0_i32_0 = arith.constant 0 : i32
    %c0_i32_1 = arith.constant 0 : i32
    return %c0_i32, %c0_i32_0 : i32, i32
  }
  func.func @transform_8(%arg0: i32) -> (i32, i32) {
    %c0_i32 = arith.constant 0 : i32
    %c0_i32_0 = arith.constant 0 : i32
    %c0_i32_1 = arith.constant 0 : i32
    return %c0_i32, %c0_i32_0 : i32, i32
  }
  func.func @transform_9(%arg0: i32) -> (i32, i32, i32) {
    %c0_i32 = arith.constant 0 : i32
    %c0_i32_0 = arith.constant 0 : i32
    %c0_i32_1 = arith.constant 0 : i32
    %c0_i32_2 = arith.constant 0 : i32
    return %c0_i32, %c0_i32_0, %c0_i32_1 : i32, i32, i32
  }
}

</mosaic_0001>

<bundles_post_ra>
// kernel: tpu_custom_call.1
= control target key start
LH: loop header
LB: loop body
LE: loop exit
PB: predicated region body
PF: predicated region fallthrough
CT: control target
= control target key end

     0   :  { %15 = vsyncpa [#allocation4], 0  ;;  %v3106_v3 = vmov 0.0|0.0   ;;  %vm3107_vm0 = vmmov 0   ;;  %v3108_v6 = vmov 0.0   ;;  %s3109_s19 = smov 32   ;;  %s3635_s0 = inlined_call_operand.vmem [shape: f32[8,2,32], index: 0, kind: input, shape index: {}]   ;;  %s3636_s1 = inlined_call_operand.vmem [shape: f32[3,2,32], index: 1, kind: input, shape index: {}]   ;;  %s3637_s2 = inlined_call_operand.vmem [shape: f32[32,32], index: 2, kind: input, shape index: {}]   ;;  %s3638_s3 = inlined_call_operand.vmem [shape: f32[1,32], index: 3, kind: input, shape index: {}]   ;;  %s3639_s4 = inlined_call_operand.vmem [shape: f32[2,64,32], index: 4, kind: input, shape index: {}]   ;;  %s3640_s5 = inlined_call_operand.vmem [shape: f32[2,1,32], index: 5, kind: input, shape index: {}]   ;;  %s3641_s6 = inlined_call_operand.vmem [shape: f32[32,128], index: 6, kind: input, shape index: {}]   ;;  %s3642_s7 = inlined_call_operand.vmem [shape: f32[1,128], index: 7, kind: input, shape index: {}]   ;;  %s3643_s8 = inlined_call_operand.hbm [shape: f32[16,128], index: 8, kind: output, shape index: {0}]   ;;  %s3644_s9 = inlined_call_operand.hbm [shape: f32[3,2,32], index: 9, kind: output, shape index: {1}]  }
   0x1   :  { %v38_v0 = vld [vmem:[%s3637_s2] sm:$0xff]  ;;  %v39_v1 = vld [vmem:[%s3637_s2 + $0x8] sm:$0xff]  ;;  %v40_v2 = vld [vmem:[%s3637_s2 + $0x10] sm:$0xff]  ;;  %2753 = vmatprep.subr.bf16.mxu0 %v3106_v3  ;;  %2358 = vmatprep.mubr.msk.f32.mxu0 %vm3107_vm0, %v3108_v6 }
   0x2   :  { %v3175_v4 = vpack.c.bf16 %v39_v1, %v38_v0  ;;  %v41_v5 = vld [vmem:[%s3637_s2 + $0x18] sm:$0xff]  ;;  %v2112_v7 = vld [vmem:[%s3636_s1 + $0x2] sm:$0x3]  ;;  %2759 = vmatprep.subr.bf16.mxu1 %v3106_v3  ;;  %2377 = vmatprep.mubr.msk.f32.mxu1 %vm3107_vm0, %v3108_v6 }
   0x3   :  { %v3189_v8 = vpack.c.bf16 %v41_v5, %v40_v2  ;;  %148 = vrot.lane.b32.xlu0 %v2112_v7, %s3109_s19 }
   0x4   :  { %2755 = vmatpush3.bf16.msra.mxu0 %v3175_v4 }
   0x5   :  { %16 = vsyncpa [#allocation6], 0  ;;  %2756 = vmatprep.subr.bf16.mxu0 %v3106_v3  ;;  %v33_v9 = vld [vmem:[%s3636_s1] sm:$0x3]  ;;  %vm64_vm1 = vcmask 261120   ;;  %v44_v11 = vld [vmem:[%s3639_s4 + $0x8] sm:$0xff] }
   0x6   :  { %v43_v10 = vld [vmem:[%s3639_s4] sm:$0xff]  ;;  %v45_v13 = vld [vmem:[%s3639_s4 + $0x10] sm:$0xff]  ;;  %v46_v14 = vld [vmem:[%s3639_s4 + $0x18] sm:$0xff]  ;;  %vm158_vm2 = vcmask 523264   ;;  %vm318_vm3 = vcmask 254976   ;;  %s3110_s15 = smov [#allocation5]  }
   0x7   :  { %v3207_v12 = vpack.c.bf16 %v44_v11, %v43_v10  ;;  %v3217_v15 = vpack.c.bf16 %v46_v14, %v45_v13  ;;  %v47_v16 = vld [vmem:[%s3639_s4 + $0x20] sm:$0xff]  ;;  %v48_v17 = vld [vmem:[%s3639_s4 + $0x28] sm:$0xff]  ;;  %v49_v19 = vld [vmem:[%s3639_s4 + $0x30] sm:$0xff] }
   0x8   :  { %2758 = vmatpush3.bf16.msra.mxu0 %v3189_v8  ;;  %v3227_v18 = vpack.c.bf16 %v48_v17, %v47_v16  ;;  %v50_v20 = vld [vmem:[%s3639_s4 + $0x38] sm:$0xff]  ;;  %v2113_v22 = vld [vmem:[%s3636_s1 + $0x4] sm:$0x3]  ;;  %v63_v23 = vld [vmem:[%s3635_s0] sm:$0x3] }
   0x9   :  { %2771 = vmatprep.subr.bf16.mxu0 %v3106_v3  ;;  %2761 = vmatpush3.bf16.msra.mxu1 %v3207_v12  ;;  %v3236_v21 = vpack.c.bf16 %v50_v20, %v49_v19  ;;  %v3251_v24 = vld [vmem:[%s3638_s3] ss:$0 sm:$0xff]  ;;  %v2115_v33 = vld [vmem:[%s3639_s4 + $0x48] sm:$0xff]  ;;  %v2116_v35 = vld [vmem:[%s3639_s4 + $0x50] sm:$0xff] }
   0xa   :  { %2762 = vmatprep.subr.bf16.mxu1 %v3106_v3  ;;  %234 = vrot.lane.b32.xlu0 %v2113_v22, %s3109_s19  ;;  %v2114_v32 = vld [vmem:[%s3639_s4 + $0x40] sm:$0xff]  ;;  %v2117_v36 = vld [vmem:[%s3639_s4 + $0x58] sm:$0xff]  ;;  %v2119_v39 = vld [vmem:[%s3639_s4 + $0x68] sm:$0xff] }
   0xb   :  { %2359 = vmatmul.mubr.msk.f32.vlgmr.msra.gmra.mrb[0].mxu0 %vm64_vm1, %v33_v9  ;;  %v3271_v34 = vpack.c.bf16 %v2115_v33, %v2114_v32  ;;  %v3283_v37 = vpack.c.bf16 %v2117_v36, %v2116_v35  ;;  %v2118_v38 = vld [vmem:[%s3639_s4 + $0x60] sm:$0xff]  ;;  %v2120_v41 = vld [vmem:[%s3639_s4 + $0x70] sm:$0xff]  ;;  %v2121_v42 = vld [vmem:[%s3639_s4 + $0x78] sm:$0xff] }
   0xc   :  { %2396 = vmatprep.mubr.msk.f32.mxu0 %vm3107_vm0, %v3108_v6  ;;  %v3295_v40 = vpack.c.bf16 %v2119_v39, %v2118_v38  ;;  %v3307_v43 = vpack.c.bf16 %v2121_v42, %v2120_v41  ;;  %v3316_v44 = vld [vmem:[%s3640_s5] ss:$0 sm:$0xff]  ;;  %v2129_v53 = vld [vmem:[%s3635_s0 + $0x2] sm:$0x3]  ;;  %v3358_v59 = vld [vmem:[%s3640_s5 + $0x1] ss:$0 sm:$0xff] }
   0xd   :  { %2764 = vmatpush3.bf16.msra.mxu1 %v3217_v15  ;;  %2773 = vmatpush3.bf16.msra.mxu0 %v3271_v34  ;;  %v2133_v13 = vld [vmem:[%s3635_s0 + $0x4] sm:$0x3]  ;;  %v2137_v36 = vld [vmem:[%s3635_s0 + $0x6] sm:$0x3] }
   0xe   :  { %2765 = vmatprep.subr.bf16.mxu1 %v3106_v3  ;;  %2774 = vmatprep.subr.bf16.mxu0 %v3106_v3 }
  0x11   :  { %2767 = vmatpush3.bf16.msra.mxu1 %v3227_v18  ;;  %2776 = vmatpush3.bf16.msra.mxu0 %v3283_v37 }
  0x12   :  { %2768 = vmatprep.subr.bf16.mxu1 %v3106_v3  ;;  %2777 = vmatprep.subr.bf16.mxu0 %v3106_v3 }
  0x15   :  { %2770 = vmatpush3.bf16.msra.mxu1 %v3236_v21  ;;  %2779 = vmatpush3.bf16.msra.mxu0 %v3295_v40 }
  0x16   :  { %2783 = vmatprep.subr.bf16.mxu1 %v3106_v3  ;;  %2780 = vmatprep.subr.bf16.mxu0 %v3106_v3 }
  0x19   :  { %2782 = vmatpush3.bf16.msra.mxu0 %v3307_v43 }
  0x1a   :  { %2789 = vmatprep.subr.bf16.mxu0 %v3106_v3 }
  0x75   :  { %v149_v29 = vpop.permute.xlu0 %148 }
  0x7c   :  { %v235_v50 = vpop.permute.xlu0 %234 }
  0xde   :  { %v134_v25 = vpop.f32.mrb[0].mxu0 }
  0xdf   :  { %v138_v26 = vadd.f32 %v134_v25, %v63_v23  ;;  %v2360_v27 = vpop.f32.mrb[1].mxu0 }
  0xe1   :  { %v145_v28 = vadd.f32 %v3251_v24, %v138_v26 }
  0xe3   :  { %3010 = vtanh.f32 %v145_v28 }
  0xed   :  { %v3011_v30 = vpop.eup %3010 }
  0xee   :  { %v151_v31 = vsel %vm64_vm1, %v3011_v30, %v149_v29 }
  0xef   :  { %2378 = vmatmul.mubr.msk.f32.vlgmr.msra.gmra.mrb[0].mxu1 %vm158_vm2, %v151_v31 }
  0xf0   :  { %2785 = vmatpush3.bf16.msra.mxu1 %v3175_v4  ;;  %2407 = vmatprep.mubr.msk.f32.mxu1 %vm3107_vm0, %v3108_v6 }
  0xf1   :  { %2786 = vmatprep.subr.bf16.mxu1 %v3106_v3 }
  0xf4   :  { %2788 = vmatpush3.bf16.msra.mxu1 %v3189_v8 }
  0xf5   :  { %2801 = vmatprep.subr.bf16.mxu1 %v3106_v3 }
  0xf7   :  { %2408 = vmatmul.mubr.msk.f32.vlgmr.msra.gmra.mrb[2].mxu1 %vm64_vm1, %v3011_v30 }
  0xf8   :  { %2445 = vmatprep.mubr.msk.f32.mxu1 %vm3107_vm0, %v3108_v6  ;;  %2803 = vmatpush3.bf16.msra.mxu1 %v3271_v34 }
  0xf9   :  { %2804 = vmatprep.subr.bf16.mxu1 %v3106_v3 }
  0xfc   :  { %2806 = vmatpush3.bf16.msra.mxu1 %v3283_v37 }
  0xfd   :  { %2807 = vmatprep.subr.bf16.mxu1 %v3106_v3 }
 0x100   :  { %2809 = vmatpush3.bf16.msra.mxu1 %v3295_v40 }
 0x101   :  { %2810 = vmatprep.subr.bf16.mxu1 %v3106_v3 }
 0x104   :  { %2812 = vmatpush3.bf16.msra.mxu1 %v3307_v43 }
 0x105   :  { %2819 = vmatprep.subr.bf16.mxu1 %v3106_v3 }
 0x1c2   :  { %v228_v45 = vpop.f32.mrb[0].mxu1 }
 0x1c3   :  { %v229_v46 = vadd.f32 %v3316_v44, %v228_v45  ;;  %v2379_v47 = vpop.f32.mrb[1].mxu1 }
 0x1c5   :  { %3012 = vtanh.f32 %v229_v46 }
 0x1ca   :  { %v391_v48 = vpop.f32.mrb[2].mxu1 }
 0x1cb   :  { %v2409_v49 = vpop.f32.mrb[3].mxu1  ;;  %v395_v54 = vadd.f32 %v2129_v53, %v391_v48 }
 0x1cd   :  { %v396_v55 = vadd.f32 %v3251_v24, %v395_v54 }
 0x1cf   :  { %v3013_v51 = vpop.eup %3012  ;;  %3014 = vtanh.f32 %v396_v55 }
 0x1d0   :  { %v237_v52 = vsel %vm64_vm1, %v3013_v51, %v235_v50  ;;  %399 = vrot.lane.b32.xlu1 %v3013_v51, %s3109_s19 }
 0x1d1   :  { %2397 = vmatmul.mubr.msk.f32.vlgmr.msra.gmra.mrb[2].mxu0 %vm158_vm2, %v237_v52 }
 0x1d2   :  { %2791 = vmatpush3.bf16.msra.mxu0 %v3207_v12  ;;  %2426 = vmatprep.mubr.msk.f32.mxu0 %vm3107_vm0, %v3108_v6 }
 0x1d3   :  { %2792 = vmatprep.subr.bf16.mxu0 %v3106_v3 }
 0x1d6   :  { %2794 = vmatpush3.bf16.msra.mxu0 %v3217_v15 }
 0x1d7   :  { %2795 = vmatprep.subr.bf16.mxu0 %v3106_v3 }
 0x1d9   :  { %v3015_v56 = vpop.eup %3014 }
 0x1da   :  { %2797 = vmatpush3.bf16.msra.mxu0 %v3227_v18 }
 0x1db   :  { %2798 = vmatprep.subr.bf16.mxu0 %v3106_v3 }
 0x1de   :  { %2800 = vmatpush3.bf16.msra.mxu0 %v3236_v21 }
 0x1df   :  { %2813 = vmatprep.subr.bf16.mxu0 %v3106_v3 }
 0x242   :  { %v400_v57 = vpop.permute.xlu1 %399 }
 0x243   :  { %v402_v58 = vsel %vm64_vm1, %v3015_v56, %v400_v57 }
 0x244   :  { %2427 = vmatmul.mubr.msk.f32.vlgmr.msra.gmra.mrb[4].mxu0 %vm158_vm2, %v402_v58  ;;  %v2141_v58 = vld [vmem:[%s3635_s0 + $0x8] sm:$0x3] }
 0x245   :  { %2815 = vmatpush3.bf16.msra.mxu0 %v3175_v4  ;;  %2456 = vmatprep.mubr.msk.f32.mxu0 %vm3107_vm0, %v3108_v6 }
 0x246   :  { %2816 = vmatprep.subr.bf16.mxu0 %v3106_v3 }
 0x249   :  { %2818 = vmatpush3.bf16.msra.mxu0 %v3189_v8 }
 0x24a   :  { %2831 = vmatprep.subr.bf16.mxu0 %v3106_v3 }
 0x24c   :  { %2457 = vmatmul.mubr.msk.f32.vlgmr.msra.gmra.mrb[6].mxu0 %vm64_vm1, %v3015_v56 }
 0x24d   :  { %2833 = vmatpush3.bf16.msra.mxu0 %v3271_v34  ;;  %2494 = vmatprep.mubr.msk.f32.mxu0 %vm3107_vm0, %v3108_v6 }
 0x24e   :  { %2834 = vmatprep.subr.bf16.mxu0 %v3106_v3 }
 0x251   :  { %2836 = vmatpush3.bf16.msra.mxu0 %v3283_v37 }
 0x252   :  { %2837 = vmatprep.subr.bf16.mxu0 %v3106_v3 }
 0x255   :  { %2839 = vmatpush3.bf16.msra.mxu0 %v3295_v40 }
 0x256   :  { %2840 = vmatprep.subr.bf16.mxu0 %v3106_v3 }
 0x259   :  { %2842 = vmatpush3.bf16.msra.mxu0 %v3307_v43 }
 0x25a   :  { %2849 = vmatprep.subr.bf16.mxu0 %v3106_v3 }
 0x2a4   :  { %v313_v60 = vpop.f32.mrb[2].mxu0 }
 0x2a5   :  { %v314_v61 = vadd.f32 %v3358_v59, %v313_v60  ;;  %v2398_v62 = vpop.f32.mrb[3].mxu0 }
 0x2a7   :  { %3016 = vtanh.f32 %v314_v61 }
 0x2b1   :  { %v3017_v63 = vpop.eup %3016 }
 0x2b2   :  { %319 = vst.msk [vmem:[#allocation2] sm:$0x3] %vm318_vm3, %v3017_v63  ;;  %478 = vrot.lane.b32.xlu1 %v3017_v63, %s3109_s19 }
 0x317   :  { %v472_v0 = vpop.f32.mrb[4].mxu0 }
 0x318   :  { %v473_v1 = vadd.f32 %v3316_v44, %v472_v0  ;;  %v2428_v2 = vpop.f32.mrb[5].mxu0 }
 0x31a   :  { %3018 = vtanh.f32 %v473_v1 }
 0x31f   :  { %v628_v5 = vpop.f32.mrb[6].mxu0 }
 0x320   :  { %v2458_v7 = vpop.f32.mrb[7].mxu0  ;;  %v632_v14 = vadd.f32 %v2133_v13, %v628_v5 }
 0x322   :  { %v633_v16 = vadd.f32 %v3251_v24, %v632_v14 }
 0x324   :  { %v3019_v9 = vpop.eup %3018  ;;  %v479_v10 = vpop.permute.xlu1 %478  ;;  %3020 = vtanh.f32 %v633_v16 }
 0x325   :  { %v481_v11 = vsel %vm64_vm1, %v3019_v9, %v479_v10  ;;  %636 = vrot.lane.b32.xlu0 %v3019_v9, %s3109_s19 }
 0x326   :  { %2446 = vmatmul.mubr.msk.f32.vlgmr.msra.gmra.mrb[4].mxu1 %vm158_vm2, %v481_v11 }
 0x327   :  { %2821 = vmatpush3.bf16.msra.mxu1 %v3207_v12  ;;  %2475 = vmatprep.mubr.msk.f32.mxu1 %vm3107_vm0, %v3108_v6 }
 0x328   :  { %2822 = vmatprep.subr.bf16.mxu1 %v3106_v3 }
 0x32b   :  { %2824 = vmatpush3.bf16.msra.mxu1 %v3217_v15 }
 0x32c   :  { %2825 = vmatprep.subr.bf16.mxu1 %v3106_v3 }
 0x32e   :  { %v3021_v17 = vpop.eup %3020 }
 0x32f   :  { %2827 = vmatpush3.bf16.msra.mxu1 %v3227_v18 }
 0x330   :  { %2828 = vmatprep.subr.bf16.mxu1 %v3106_v3 }
 0x333   :  { %2830 = vmatpush3.bf16.msra.mxu1 %v3236_v21 }
 0x334   :  { %2843 = vmatprep.subr.bf16.mxu1 %v3106_v3 }
 0x397   :  { %v637_v19 = vpop.permute.xlu0 %636 }
 0x398   :  { %v639_v20 = vsel %vm64_vm1, %v3021_v17, %v637_v19 }
 0x399   :  { %2476 = vmatmul.mubr.msk.f32.vlgmr.msra.gmra.mrb[6].mxu1 %vm158_vm2, %v639_v20  ;;  %v2145_v20 = vld [vmem:[%s3635_s0 + $0xa] sm:$0x3] }
 0x39a   :  { %2845 = vmatpush3.bf16.msra.mxu1 %v3175_v4  ;;  %2505 = vmatprep.mubr.msk.f32.mxu1 %vm3107_vm0, %v3108_v6 }
 0x39b   :  { %2846 = vmatprep.subr.bf16.mxu1 %v3106_v3 }
 0x39e   :  { %2848 = vmatpush3.bf16.msra.mxu1 %v3189_v8 }
 0x39f   :  { %2861 = vmatprep.subr.bf16.mxu1 %v3106_v3 }
 0x3a1   :  { %2506 = vmatmul.mubr.msk.f32.vlgmr.msra.gmra.mrb[8].mxu1 %vm64_vm1, %v3021_v17 }
 0x3a2   :  { %2863 = vmatpush3.bf16.msra.mxu1 %v3271_v34  ;;  %2543 = vmatprep.mubr.msk.f32.mxu1 %vm3107_vm0, %v3108_v6 }
 0x3a3   :  { %2864 = vmatprep.subr.bf16.mxu1 %v3106_v3 }
 0x3a6   :  { %2866 = vmatpush3.bf16.msra.mxu1 %v3283_v37 }
 0x3a7   :  { %2867 = vmatprep.subr.bf16.mxu1 %v3106_v3 }
 0x3aa   :  { %2869 = vmatpush3.bf16.msra.mxu1 %v3295_v40 }
 0x3ab   :  { %2870 = vmatprep.subr.bf16.mxu1 %v3106_v3 }
 0x3ae   :  { %2872 = vmatpush3.bf16.msra.mxu1 %v3307_v43 }
 0x3af   :  { %2879 = vmatprep.subr.bf16.mxu1 %v3106_v3 }
 0x3f9   :  { %v551_v22 = vpop.f32.mrb[4].mxu1 }
 0x3fa   :  { %v552_v23 = vadd.f32 %v3358_v59, %v551_v22  ;;  %v2447_v25 = vpop.f32.mrb[5].mxu1 }
 0x3fc   :  { %3022 = vtanh.f32 %v552_v23 }
 0x406   :  { %v3023_v26 = vpop.eup %3022 }
 0x407   :  { %556 = vst.msk [vmem:[#allocation2 + $0x2] sm:$0x3] %vm318_vm3, %v3023_v26  ;;  %715 = vrot.lane.b32.xlu1 %v3023_v26, %s3109_s19 }
 0x46c   :  { %v709_v27 = vpop.f32.mrb[6].mxu1 }
 0x46d   :  { %v710_v28 = vadd.f32 %v3316_v44, %v709_v27  ;;  %v2477_v29 = vpop.f32.mrb[7].mxu1 }
 0x46f   :  { %3024 = vtanh.f32 %v710_v28 }
 0x474   :  { %v865_v30 = vpop.f32.mrb[8].mxu1 }
 0x475   :  { %v2507_v31 = vpop.f32.mrb[9].mxu1  ;;  %v869_v38 = vadd.f32 %v2137_v36, %v865_v30 }
 0x477   :  { %v870_v39 = vadd.f32 %v3251_v24, %v869_v38 }
 0x479   :  { %v3025_v32 = vpop.eup %3024  ;;  %v716_v33 = vpop.permute.xlu1 %715  ;;  %3026 = vtanh.f32 %v870_v39 }
 0x47a   :  { %v718_v35 = vsel %vm64_vm1, %v3025_v32, %v716_v33  ;;  %873 = vrot.lane.b32.xlu0 %v3025_v32, %s3109_s19 }
 0x47b   :  { %2495 = vmatmul.mubr.msk.f32.vlgmr.msra.gmra.mrb[8].mxu0 %vm158_vm2, %v718_v35 }
 0x47c   :  { %2851 = vmatpush3.bf16.msra.mxu0 %v3207_v12  ;;  %2524 = vmatprep.mubr.msk.f32.mxu0 %vm3107_vm0, %v3108_v6 }
 0x47d   :  { %2852 = vmatprep.subr.bf16.mxu0 %v3106_v3 }
 0x480   :  { %2854 = vmatpush3.bf16.msra.mxu0 %v3217_v15 }
 0x481   :  { %2855 = vmatprep.subr.bf16.mxu0 %v3106_v3 }
 0x483   :  { %v3027_v41 = vpop.eup %3026 }
 0x484   :  { %2857 = vmatpush3.bf16.msra.mxu0 %v3227_v18 }
 0x485   :  { %2858 = vmatprep.subr.bf16.mxu0 %v3106_v3 }
 0x488   :  { %2860 = vmatpush3.bf16.msra.mxu0 %v3236_v21 }
 0x489   :  { %2873 = vmatprep.subr.bf16.mxu0 %v3106_v3 }
 0x4ec   :  { %v874_v42 = vpop.permute.xlu0 %873 }
 0x4ed   :  { %v876_v45 = vsel %vm64_vm1, %v3027_v41, %v874_v42 }
 0x4ee   :  { %2525 = vmatmul.mubr.msk.f32.vlgmr.msra.gmra.mrb[10].mxu0 %vm158_vm2, %v876_v45  ;;  %v2149_v45 = vld [vmem:[%s3635_s0 + $0xc] sm:$0x3] }
 0x4ef   :  { %2875 = vmatpush3.bf16.msra.mxu0 %v3175_v4  ;;  %2554 = vmatprep.mubr.msk.f32.mxu0 %vm3107_vm0, %v3108_v6 }
 0x4f0   :  { %2876 = vmatprep.subr.bf16.mxu0 %v3106_v3 }
 0x4f3   :  { %2878 = vmatpush3.bf16.msra.mxu0 %v3189_v8 }
 0x4f4   :  { %2891 = vmatprep.subr.bf16.mxu0 %v3106_v3 }
 0x4f6   :  { %2555 = vmatmul.mubr.msk.f32.vlgmr.msra.gmra.mrb[12].mxu0 %vm64_vm1, %v3027_v41 }
 0x4f7   :  { %2893 = vmatpush3.bf16.msra.mxu0 %v3271_v34  ;;  %2592 = vmatprep.mubr.msk.f32.mxu0 %vm3107_vm0, %v3108_v6 }
 0x4f8   :  { %2894 = vmatprep.subr.bf16.mxu0 %v3106_v3 }
 0x4fb   :  { %2896 = vmatpush3.bf16.msra.mxu0 %v3283_v37 }
 0x4fc   :  { %2897 = vmatprep.subr.bf16.mxu0 %v3106_v3 }
 0x4ff   :  { %2899 = vmatpush3.bf16.msra.mxu0 %v3295_v40 }
 0x500   :  { %2900 = vmatprep.subr.bf16.mxu0 %v3106_v3 }
 0x503   :  { %2902 = vmatpush3.bf16.msra.mxu0 %v3307_v43 }
 0x504   :  { %2909 = vmatprep.subr.bf16.mxu0 %v3106_v3 }
 0x54e   :  { %v788_v46 = vpop.f32.mrb[8].mxu0 }
 0x54f   :  { %v789_v47 = vadd.f32 %v3358_v59, %v788_v46  ;;  %v2496_v48 = vpop.f32.mrb[9].mxu0 }
 0x551   :  { %3028 = vtanh.f32 %v789_v47 }
 0x55b   :  { %v3029_v49 = vpop.eup %3028 }
 0x55c   :  { %793 = vst.msk [vmem:[#allocation2 + $0x4] sm:$0x3] %vm318_vm3, %v3029_v49  ;;  %952 = vrot.lane.b32.xlu1 %v3029_v49, %s3109_s19 }
 0x5c1   :  { %v946_v50 = vpop.f32.mrb[10].mxu0 }
 0x5c2   :  { %v947_v51 = vadd.f32 %v3316_v44, %v946_v50  ;;  %v2526_v52 = vpop.f32.mrb[11].mxu0 }
 0x5c4   :  { %3030 = vtanh.f32 %v947_v51 }
 0x5c9   :  { %v1102_v53 = vpop.f32.mrb[12].mxu0 }
 0x5ca   :  { %v2556_v54 = vpop.f32.mrb[13].mxu0  ;;  %v1106_v60 = vadd.f32 %v2141_v58, %v1102_v53 }
 0x5cc   :  { %v1107_v61 = vadd.f32 %v3251_v24, %v1106_v60 }
 0x5ce   :  { %v3031_v55 = vpop.eup %3030  ;;  %v953_v56 = vpop.permute.xlu1 %952  ;;  %3032 = vtanh.f32 %v1107_v61 }
 0x5cf   :  { %v955_v57 = vsel %vm64_vm1, %v3031_v55, %v953_v56  ;;  %1110 = vrot.lane.b32.xlu0 %v3031_v55, %s3109_s19 }
 0x5d0   :  { %2544 = vmatmul.mubr.msk.f32.vlgmr.msra.gmra.mrb[10].mxu1 %vm158_vm2, %v955_v57 }
 0x5d1   :  { %2881 = vmatpush3.bf16.msra.mxu1 %v3207_v12  ;;  %2573 = vmatprep.mubr.msk.f32.mxu1 %vm3107_vm0, %v3108_v6 }
 0x5d2   :  { %2882 = vmatprep.subr.bf16.mxu1 %v3106_v3 }
 0x5d5   :  { %2884 = vmatpush3.bf16.msra.mxu1 %v3217_v15 }
 0x5d6   :  { %2885 = vmatprep.subr.bf16.mxu1 %v3106_v3 }
 0x5d8   :  { %v3033_v62 = vpop.eup %3032 }
 0x5d9   :  { %2887 = vmatpush3.bf16.msra.mxu1 %v3227_v18 }
 0x5da   :  { %2888 = vmatprep.subr.bf16.mxu1 %v3106_v3 }
 0x5dd   :  { %2890 = vmatpush3.bf16.msra.mxu1 %v3236_v21 }
 0x5de   :  { %2903 = vmatprep.subr.bf16.mxu1 %v3106_v3 }
 0x641   :  { %v1111_v63 = vpop.permute.xlu0 %1110 }
 0x642   :  { %v1113_v0 = vsel %vm64_vm1, %v3033_v62, %v1111_v63 }
 0x643   :  { %2574 = vmatmul.mubr.msk.f32.vlgmr.msra.gmra.mrb[12].mxu1 %vm158_vm2, %v1113_v0 }
 0x644   :  { %2905 = vmatpush3.bf16.msra.mxu1 %v3175_v4  ;;  %2603 = vmatprep.mubr.msk.f32.mxu1 %vm3107_vm0, %v3108_v6 }
 0x645   :  { %2906 = vmatprep.subr.bf16.mxu1 %v3106_v3 }
 0x648   :  { %2908 = vmatpush3.bf16.msra.mxu1 %v3189_v8 }
 0x649   :  { %2921 = vmatprep.subr.bf16.mxu1 %v3106_v3 }
 0x64b   :  { %2604 = vmatmul.mubr.msk.f32.vlgmr.msra.gmra.mrb[14].mxu1 %vm64_vm1, %v3033_v62 }
 0x64c   :  { %2923 = vmatpush3.bf16.msra.mxu1 %v3271_v34  ;;  %2641 = vmatprep.mubr.msk.f32.mxu1 %vm3107_vm0, %v3108_v6 }
 0x64d   :  { %2924 = vmatprep.subr.bf16.mxu1 %v3106_v3 }
 0x650   :  { %2926 = vmatpush3.bf16.msra.mxu1 %v3283_v37 }
 0x651   :  { %2927 = vmatprep.subr.bf16.mxu1 %v3106_v3 }
 0x654   :  { %2929 = vmatpush3.bf16.msra.mxu1 %v3295_v40 }
 0x655   :  { %2930 = vmatprep.subr.bf16.mxu1 %v3106_v3 }
 0x658   :  { %2932 = vmatpush3.bf16.msra.mxu1 %v3307_v43 }
 0x659   :  { %2939 = vmatprep.subr.bf16.mxu1 %v3106_v3 }
 0x6a3   :  { %v1025_v1 = vpop.f32.mrb[10].mxu1 }
 0x6a4   :  { %v1026_v2 = vadd.f32 %v3358_v59, %v1025_v1  ;;  %v2545_v5 = vpop.f32.mrb[11].mxu1 }
 0x6a6   :  { %3034 = vtanh.f32 %v1026_v2 }
 0x6b0   :  { %v3035_v7 = vpop.eup %3034 }
 0x6b1   :  { %1030 = vst.msk [vmem:[#allocation2 + $0x6] sm:$0x3] %vm318_vm3, %v3035_v7  ;;  %1189 = vrot.lane.b32.xlu1 %v3035_v7, %s3109_s19  ;;  %v1981_v7 = vld [vmem:[%s3641_s6] sm:$0xff] }
 0x716   :  { %v1183_v9 = vpop.f32.mrb[12].mxu1 }
 0x717   :  { %v1184_v10 = vadd.f32 %v3316_v44, %v1183_v9  ;;  %v2575_v11 = vpop.f32.mrb[13].mxu1  ;;  %v1982_v9 = vld [vmem:[%s3641_s6 + $0x8] sm:$0xff] }
 0x718   :  { %v1984_v11 = vld [vmem:[%s3641_s6 + $0x18] sm:$0xff] }
 0x719   :  { %3036 = vtanh.f32 %v1184_v10  ;;  %v2993_v10 = vpack.c.bf16 %v1982_v9, %v1981_v7 }
 0x71e   :  { %v1339_v13 = vpop.f32.mrb[14].mxu1 }
 0x71f   :  { %v2605_v14 = vpop.f32.mrb[15].mxu1  ;;  %v1343_v22 = vadd.f32 %v2145_v20, %v1339_v13 }
 0x721   :  { %v1344_v23 = vadd.f32 %v3251_v24, %v1343_v22 }
 0x723   :  { %v3037_v16 = vpop.eup %3036  ;;  %v1190_v17 = vpop.permute.xlu1 %1189  ;;  %3038 = vtanh.f32 %v1344_v23 }
 0x724   :  { %v1192_v19 = vsel %vm64_vm1, %v3037_v16, %v1190_v17  ;;  %1347 = vrot.lane.b32.xlu0 %v3037_v16, %s3109_s19 }
 0x725   :  { %2593 = vmatmul.mubr.msk.f32.vlgmr.msra.gmra.mrb[14].mxu0 %vm158_vm2, %v1192_v19 }
 0x726   :  { %2911 = vmatpush3.bf16.msra.mxu0 %v3207_v12  ;;  %2622 = vmatprep.mubr.msk.f32.mxu0 %vm3107_vm0, %v3108_v6 }
 0x727   :  { %2912 = vmatprep.subr.bf16.mxu0 %v3106_v3 }
 0x72a   :  { %2914 = vmatpush3.bf16.msra.mxu0 %v3217_v15 }
 0x72b   :  { %2915 = vmatprep.subr.bf16.mxu0 %v3106_v3 }
 0x72d   :  { %v3039_v25 = vpop.eup %3038 }
 0x72e   :  { %2917 = vmatpush3.bf16.msra.mxu0 %v3227_v18 }
 0x72f   :  { %2918 = vmatprep.subr.bf16.mxu0 %v3106_v3 }
 0x732   :  { %2920 = vmatpush3.bf16.msra.mxu0 %v3236_v21 }
 0x733   :  { %2933 = vmatprep.subr.bf16.mxu0 %v3106_v3 }
 0x796   :  { %v1348_v26 = vpop.permute.xlu0 %1347 }
 0x797   :  { %v1350_v27 = vsel %vm64_vm1, %v3039_v25, %v1348_v26 }
 0x798   :  { %2623 = vmatmul.mubr.msk.f32.vlgmr.msra.gmra.mrb[16].mxu0 %vm158_vm2, %v1350_v27 }
 0x799   :  { %2935 = vmatpush3.bf16.msra.mxu0 %v3175_v4  ;;  %2652 = vmatprep.mubr.msk.f32.mxu0 %vm3107_vm0, %v3108_v6 }
 0x79a   :  { %2936 = vmatprep.subr.bf16.mxu0 %v3106_v3 }
 0x79d   :  { %2938 = vmatpush3.bf16.msra.mxu0 %v3189_v8 }
 0x79e   :  { %2951 = vmatprep.subr.bf16.mxu0 %v3106_v3 }
 0x7a0   :  { %2653 = vmatmul.mubr.msk.f32.vlgmr.msra.gmra.mrb[18].mxu0 %vm64_vm1, %v3039_v25 }
 0x7a1   :  { %2953 = vmatpush3.bf16.msra.mxu0 %v3271_v34  ;;  %2690 = vmatprep.mubr.msk.f32.mxu0 %vm3107_vm0, %v3108_v6 }
 0x7a2   :  { %2954 = vmatprep.subr.bf16.mxu0 %v3106_v3 }
 0x7a5   :  { %2956 = vmatpush3.bf16.msra.mxu0 %v3283_v37 }
 0x7a6   :  { %2957 = vmatprep.subr.bf16.mxu0 %v3106_v3 }
 0x7a9   :  { %2959 = vmatpush3.bf16.msra.mxu0 %v3295_v40 }
 0x7aa   :  { %2960 = vmatprep.subr.bf16.mxu0 %v3106_v3 }
 0x7ad   :  { %2962 = vmatpush3.bf16.msra.mxu0 %v3307_v43 }
 0x7ae   :  { %2969 = vmatprep.subr.bf16.mxu0 %v3106_v3 }
 0x7f8   :  { %v1262_v28 = vpop.f32.mrb[14].mxu0 }
 0x7f9   :  { %v1263_v29 = vadd.f32 %v3358_v59, %v1262_v28  ;;  %v2594_v30 = vpop.f32.mrb[15].mxu0 }
 0x7fb   :  { %3040 = vtanh.f32 %v1263_v29 }
 0x805   :  { %v3041_v31 = vpop.eup %3040 }
 0x806   :  { %1267 = vst.msk [vmem:[#allocation2 + $0x8] sm:$0x3] %vm318_vm3, %v3041_v31  ;;  %1426 = vrot.lane.b32.xlu1 %v3041_v31, %s3109_s19 }
 0x86b   :  { %v1420_v32 = vpop.f32.mrb[16].mxu0 }
 0x86c   :  { %v1421_v33 = vadd.f32 %v3316_v44, %v1420_v32  ;;  %v2624_v35 = vpop.f32.mrb[17].mxu0 }
 0x86e   :  { %3042 = vtanh.f32 %v1421_v33 }
 0x873   :  { %v1576_v36 = vpop.f32.mrb[18].mxu0 }
 0x874   :  { %v2654_v38 = vpop.f32.mrb[19].mxu0  ;;  %v1580_v46 = vadd.f32 %v2149_v45, %v1576_v36 }
 0x876   :  { %v1581_v47 = vadd.f32 %v3251_v24, %v1580_v46 }
 0x878   :  { %v3043_v39 = vpop.eup %3042  ;;  %v1427_v41 = vpop.permute.xlu1 %1426  ;;  %3044 = vtanh.f32 %v1581_v47 }
 0x879   :  { %v1429_v42 = vsel %vm64_vm1, %v3043_v39, %v1427_v41  ;;  %1584 = vrot.lane.b32.xlu0 %v3043_v39, %s3109_s19 }
 0x87a   :  { %2642 = vmatmul.mubr.msk.f32.vlgmr.msra.gmra.mrb[16].mxu1 %vm158_vm2, %v1429_v42 }
 0x87b   :  { %2941 = vmatpush3.bf16.msra.mxu1 %v3207_v12  ;;  %2671 = vmatprep.mubr.msk.f32.mxu1 %vm3107_vm0, %v3108_v6 }
 0x87c   :  { %2942 = vmatprep.subr.bf16.mxu1 %v3106_v3 }
 0x87f   :  { %2944 = vmatpush3.bf16.msra.mxu1 %v3217_v15 }
 0x880   :  { %2945 = vmatprep.subr.bf16.mxu1 %v3106_v3 }
 0x882   :  { %v3045_v48 = vpop.eup %3044 }
 0x883   :  { %2947 = vmatpush3.bf16.msra.mxu1 %v3227_v18 }
 0x884   :  { %2948 = vmatprep.subr.bf16.mxu1 %v3106_v3 }
 0x887   :  { %2950 = vmatpush3.bf16.msra.mxu1 %v3236_v21 }
 0x888   :  { %2963 = vmatprep.subr.bf16.mxu1 %v3106_v3 }
 0x8eb   :  { %v1585_v49 = vpop.permute.xlu0 %1584 }
 0x8ec   :  { %v1587_v50 = vsel %vm64_vm1, %v3045_v48, %v1585_v49 }
 0x8ed   :  { %2672 = vmatmul.mubr.msk.f32.vlgmr.msra.gmra.mrb[18].mxu1 %vm158_vm2, %v1587_v50 }
 0x8ee   :  { %2965 = vmatpush3.bf16.msra.mxu1 %v3175_v4  ;;  %2701 = vmatprep.mubr.msk.f32.mxu1 %vm3107_vm0, %v3108_v6 }
 0x8ef   :  { %2966 = vmatprep.subr.bf16.mxu1 %v3106_v3 }
 0x8f2   :  { %2968 = vmatpush3.bf16.msra.mxu1 %v3189_v8 }
 0x8f3   :  { %2981 = vmatprep.subr.bf16.mxu1 %v3106_v3 }
 0x8f5   :  { %2702 = vmatmul.mubr.msk.f32.vlgmr.msra.gmra.mrb[20].mxu1 %vm64_vm1, %v3045_v48 }
 0x8f6   :  { %2983 = vmatpush3.bf16.msra.mxu1 %v3271_v34  ;;  %2739 = vmatprep.mubr.msk.f32.mxu1 %vm3107_vm0, %v3108_v6 }
 0x8f7   :  { %2984 = vmatprep.subr.bf16.mxu1 %v3106_v3 }
 0x8fa   :  { %2986 = vmatpush3.bf16.msra.mxu1 %v3283_v37 }
 0x8fb   :  { %2987 = vmatprep.subr.bf16.mxu1 %v3106_v3 }
 0x8fe   :  { %2989 = vmatpush3.bf16.msra.mxu1 %v3295_v40  ;;  %v2153_v40 = vld [vmem:[%s3635_s0 + $0xe] sm:$0x3] }
 0x8ff   :  { %2990 = vmatprep.subr.bf16.mxu1 %v3106_v3 }
 0x902   :  { %2992 = vmatpush3.bf16.msra.mxu1 %v3307_v43 }
 0x94d   :  { %v1499_v4 = vpop.f32.mrb[16].mxu1 }
 0x94e   :  { %v1500_v8 = vadd.f32 %v3358_v59, %v1499_v4  ;;  %v2643_v51 = vpop.f32.mrb[17].mxu1 }
 0x950   :  { %3046 = vtanh.f32 %v1500_v8 }
 0x95a   :  { %v3047_v34 = vpop.eup %3046 }
 0x95b   :  { %1504 = vst.msk [vmem:[#allocation2 + $0xa] sm:$0x3] %vm318_vm3, %v3047_v34  ;;  %1663 = vrot.lane.b32.xlu1 %v3047_v34, %s3109_s19 }
 0x9c0   :  { %v1657_v52 = vpop.f32.mrb[18].mxu1 }
 0x9c1   :  { %v1658_v37 = vadd.f32 %v3316_v44, %v1657_v52  ;;  %v2673_v53 = vpop.f32.mrb[19].mxu1 }
 0x9c3   :  { %3048 = vtanh.f32 %v1658_v37 }
 0x9c8   :  { %v1813_v43 = vpop.f32.mrb[20].mxu1 }
 0x9c9   :  { %v1817_v54 = vadd.f32 %v2153_v40, %v1813_v43  ;;  %v2703_v55 = vpop.f32.mrb[21].mxu1 }
 0x9cb   :  { %v1818_v56 = vadd.f32 %v3251_v24, %v1817_v54 }
 0x9cd   :  { %v3049_v57 = vpop.eup %3048  ;;  %3050 = vtanh.f32 %v1818_v56  ;;  %v1664_v58 = vpop.permute.xlu1 %1663 }
 0x9ce   :  { %v1666_v60 = vsel %vm64_vm1, %v3049_v57, %v1664_v58  ;;  %1821 = vrot.lane.b32.xlu0 %v3049_v57, %s3109_s19 }
 0x9cf   :  { %2691 = vmatmul.mubr.msk.f32.vlgmr.msra.gmra.mrb[20].mxu0 %vm158_vm2, %v1666_v60 }
 0x9d0   :  { %2971 = vmatpush3.bf16.msra.mxu0 %v3207_v12  ;;  %2720 = vmatprep.mubr.msk.f32.mxu0 %vm3107_vm0, %v3108_v6  ;;  %v1979_v6 = vld [vmem:[#allocation2] sm:$0xff] }
 0x9d1   :  { %2972 = vmatprep.subr.bf16.mxu0 %v3106_v3 }
 0x9d4   :  { %2974 = vmatpush3.bf16.msra.mxu0 %v3217_v15 }
 0x9d5   :  { %2975 = vmatprep.subr.bf16.mxu0 %v3106_v3 }
 0x9d7   :  { %v3051_v24 = vpop.eup %3050 }
 0x9d8   :  { %2075 = vst.msk [vmem:[#allocation5] sm:$0x3] %vm318_vm3, %v3051_v24  ;;  %2977 = vmatpush3.bf16.msra.mxu0 %v3227_v18 }
 0x9d9   :  { %2978 = vmatprep.subr.bf16.mxu0 %v3106_v3 }
 0x9dc   :  { %2980 = vmatpush3.bf16.msra.mxu0 %v3236_v21 }
 0x9dd   :  { %2994 = vmatprep.subr.bf16.mxu0 %v2993_v10 }
 0xa40   :  { %v1822_v61 = vpop.permute.xlu0 %1821 }
 0xa41   :  { %v1824_v12 = vsel %vm64_vm1, %v3051_v24, %v1822_v61 }
 0xa42   :  { %2721 = vmatmul.mubr.msk.f32.vlgmr.msra.gmra.mrb[22].mxu0 %vm158_vm2, %v1824_v12 }
 0xa43   :  { %2750 = vmatprep.mubr.msk.f32.mxu0 %vm64_vm1, %v1979_v6  ;;  %2996 = vmatpush3.bf16.msra.mxu0 %v2993_v10 }
 0xaa2   :  { %v1736_v15 = vpop.f32.mrb[20].mxu0 }
 0xaa3   :  { %v1737_v62 = vadd.f32 %v3358_v59, %v1736_v15  ;;  %v2692_v63 = vpop.f32.mrb[21].mxu0 }
 0xaa5   :  { %3052 = vtanh.f32 %v1737_v62 }
 0xaaf   :  { %v3053_v0 = vpop.eup %3052 }
 0xab0   :  { %1741 = vst.msk [vmem:[#allocation2 + $0xc] sm:$0x3] %vm318_vm3, %v3053_v0  ;;  %1900 = vrot.lane.b32.xlu1 %v3053_v0, %s3109_s19 }
 0xb15   :  { %v1894_v3 = vpop.f32.mrb[22].mxu0 }
 0xb16   :  { %v1895_v18 = vadd.f32 %v3316_v44, %v1894_v3  ;;  %v2722_v21 = vpop.f32.mrb[23].mxu0  ;;  %v1983_v44 = vld [vmem:[%s3641_s6 + $0x10] sm:$0xff]  ;;  %s2097_s6 = sshll.u32 %s3110_s15, 4  ;;  %s2098_s6 = int_to_ptr.vmem [resolvable:$true] %s2097_s6 }
 0xb17   :  { %v2997_v13 = vpack.c.bf16 %v1984_v11, %v1983_v44  ;;  %s3058_s16 = scalar_lea.vmem %s2098_s6, 96  ;;  %p3063_p1 = scmp.lt.s32.totalorder %s2098_s6, %s2098_s6 }
 0xb18   :  { %3054 = vtanh.f32 %v1895_v18  ;;  %p3059_p0 = scmp.ne.s32.totalorder %s2098_s6, %s3058_s16  ;;  %p3064_p2 = scmp.lt.s32.totalorder %s3058_s16, %s3058_s16 }
 0xb19   :  { %2998 = vmatprep.subr.bf16.mxu0 %v2997_v13 }
 0xb1a   :  { %3000 = vmatpush3.bf16.msra.mxu0 %v2997_v13  ;;  %p3065_p3 = por %p3064_p2, %p3063_p1 }
 0xb1c   :  { %p3066_p4 = pnand %p3065_p3, %p3059_p0 }
 0xb22   :  { %v3055_v1 = vpop.eup %3054  ;;  %v1901_v2 = vpop.permute.xlu1 %1900 }
 0xb23   :  { %2077 = vst.msk [vmem:[#allocation5 + $0x2] sm:$0x3] %vm318_vm3, %v3055_v1  ;;  %v1903_v5 = vsel %vm64_vm1, %v3055_v1, %v1901_v2 }
 0xb24   :  { %2740 = vmatmul.mubr.msk.f32.vlgmr.msra.gmra.mrb[22].mxu1 %vm158_vm2, %v1903_v5 }
 0xbf7   :  { %v1973_v14 = vpop.f32.mrb[22].mxu1 }
 0xbf8   :  { %v1974_v16 = vadd.f32 %v3358_v59, %v1973_v14  ;;  %v2741_v17 = vpop.f32.mrb[23].mxu1 }
 0xbfa   :  { %3056 = vtanh.f32 %v1974_v16 }
 0xc04   :  { %v3057_v19 = vpop.eup %3056 }
 0xc05   :  { %1978 = vst.msk [vmem:[#allocation2 + $0xe] sm:$0x3] %vm318_vm3, %v3057_v19  ;;  %2079 = vst.msk [vmem:[#allocation5 + $0x4] sm:$0x3] %vm318_vm3, %v3057_v19 }
 0xc0c   :  { %v1980_v20 = vld [vmem:[#allocation2 + $0x8] sm:$0xff] }
 0xc0d   :  { %2751 = vmatmul.mubr.msk.f32.vlgmr.msra.gmra.mrb[24].mxu0 %vm64_vm1, %v1980_v20 }
 0xc0e   :  { %3069 = shalt.err (!%p3066_p4)
}
 0xc0f   :  { %s3070_s18 = scalar_lea.hbm %s3644_s9, 96 }
 0xc10   :  { %p3071_p5 = scmp.ne.s32.totalorder %s3644_s9, %s3070_s18  ;;  %p3074_p6 = scmp.lt.u32.totalorder %s3070_s18, %s3644_s9 }
 0xc12   :  { %p3076_p7 = pnand %p3074_p6, %p3071_p5 }
 0xc14   :  { %3079 = shalt.err (!%p3076_p7)
}
 0xc15   :  { %s3111_s1 = smov 2   ;;  %v2157_v59 = vld [vmem:[%s3642_s7] ss:$0 sm:$0xff]  ;;  %s3112_s25 = smov [#allocation3]  }
 0xc16   :  { %2103 = dma.vmem_to_hbm [thread:$0]  %s2098_s6, 96, %s3644_s9, [#allocation6], %s3109_s19, %s3109_s19, %s3111_s1  }
 0xc17   :  { %s2085_s26 = sshll.u32 %s3112_s25, 4  ;;  %s2086_s26 = int_to_ptr.vmem [resolvable:$true] %s2085_s26 }
 0xc18   :  { %s3080_s27 = scalar_lea.vmem %s2086_s26, 256  ;;  %p3085_p9 = scmp.lt.s32.totalorder %s2086_s26, %s2086_s26 }
 0xc19   :  { %p3081_p8 = scmp.ne.s32.totalorder %s2086_s26, %s3080_s27  ;;  %p3086_p10 = scmp.lt.s32.totalorder %s3080_s27, %s3080_s27 }
 0xc1b   :  { %p3087_p11 = por %p3086_p10, %p3085_p9 }
 0xc1d   :  { %p3088_p12 = pnand %p3087_p11, %p3081_p8 }
 0xce0   :  { %v2752_v22 = vpop.f32.mrb[24].mxu0 }
 0xce1   :  { %v2070_v23 = vadd.f32 %v2752_v22, %v2157_v59  ;;  %v2064_v25 = vpop.f32.mrb[25].mxu0 }
 0xce2   :  { %v2065_v26 = vadd.f32 %v2157_v59, %v2064_v25 }
 0xce3   :  { %2074 = vst [vmem:[#allocation3 + $0x8] sm:$0xff] %v2070_v23 }
 0xce4   :  { %2073 = vst [vmem:[#allocation3] sm:$0xff] %v2065_v26 }
 0xce5   :  { %3091 = shalt.err (!%p3088_p12)
}
 0xce6   :  { %s3092_s7 = scalar_lea.hbm %s3643_s8, 256 }
 0xce7   :  { %p3093_p13 = scmp.ne.s32.totalorder %s3643_s8, %s3092_s7  ;;  %p3096_p0 = scmp.lt.u32.totalorder %s3092_s7, %s3643_s8 }
 0xce9   :  { %p3098_p1 = pnand %p3096_p0, %p3093_p13 }
 0xceb   :  { %3101 = shalt.err (!%p3098_p1)
}
 0xcec   :  { %s3113_s10 = smov 128   ;;  %s3114_s11 = smov 8  }
 0xced   :  { %2091 = dma.vmem_to_hbm [thread:$0]  %s2086_s26, 256, %s3643_s8, [#allocation4], %s3113_s10, %s3113_s10, %s3114_s11  }
 0xcee   :  { %3102 = dma.done.wait [#allocation4], 256  }
 0xcef   :  { %3103 = vsyncadd [#allocation4], 4294967040 }
 0xcf0   :  { %3104 = dma.done.wait [#allocation6], 96  }
 0xcf1   :  { %3105 = vsyncadd [#allocation6], 4294967200 }
 0xcf2   :  { %2110 = vsyncpa [#allocation4], 1 }
 0xcf3   :  { %2111 = vsyncpa [#allocation6], 1 }

</bundles_post_ra>
